<compile_context>
chip_gen: v7x
topology: tpu7x:2x2x1
jax: 0.10.0
libtpu: 0.0.40
codegen_flags: <defaults>
</compile_context>

<pallas_src>
import jax
import jax.numpy as jnp
from jax import lax
from jax.experimental import pallas as pl
from jax.experimental.pallas import tpu as pltpu


_TARGET_TILE_BYTES = 4 * 1024 * 1024   # f32 bytes per input chunk (pre double-buffering)
_VMEM_LIMIT_BYTES = 48 * 1024 * 1024   # < 64 MiB physical/TC on v7x, ample on v5e/v6e


def _make_tv_kernel(num_valid_planes, planes_per_step, mask_last_block):
    """Build the per-chunk partial-sum kernel.

    The kernel sees one (P, H, W) chunk of planes and writes
      oh_ref: (1, 1, W)   sum over planes/rows of vertical-diff^2, per lane.
      ow_ref: (1, 1, W-1) sum over planes/rows of horizontal-diff^2, per lane.
    The single cross-lane reduction and the scalar normalization happen once
    in the wrapper.
    """

    def kernel(x_ref, oh_ref, ow_ref):
        x = x_ref[...]                                           # (P, H, W), native dtype

        if mask_last_block:
            # The last grid step may cover fewer than P valid planes; the
            # out-of-bounds tail of the block holds undefined VMEM contents,
            # so zero invalid planes *before* any arithmetic.  Zeroed planes
            # contribute nothing to either sum (diffs never cross planes).
            pid = pl.program_id(0)
            plane_ids = pid * planes_per_step + lax.broadcasted_iota(
                jnp.int32, (planes_per_step, 1, 1), 0)
            x = jnp.where(plane_ids < num_valid_planes, x, jnp.zeros_like(x))

        # Diffs in the native dtype (exact for f32; bf16 subtraction runs on
        # the packed bf16 VPU on v6e/v7x); only the diff is cast to f32 for
        # squaring / accumulation, avoiding a full-tile f32 input copy.
        # TODO(synk): if the bundle dump shows the shifted slices below
        # materializing full-tile copies, rebuild the shifted operand with
        # pltpu.roll (+ wrap-row/column correction) instead of slicing.

        # Vertical (H) diffs -- finish this pass before the horizontal one so
        # only one full-tile temporary is live at a time.
        hd = (x[:, 1:, :] - x[:, :-1, :]).astype(jnp.float32)    # (P, H-1, W)
        h2d = jnp.sum(hd * hd, axis=0)                           # (H-1, W) plane reduce
        oh_ref[...] = jnp.sum(h2d, axis=0, keepdims=True).reshape(oh_ref.shape)

        # Horizontal (W) diffs.
        wd = (x[:, :, 1:] - x[:, :, :-1]).astype(jnp.float32)    # (P, H, W-1)
        w2d = jnp.sum(wd * wd, axis=0)                           # (H, W-1)
        ow_ref[...] = jnp.sum(w2d, axis=0, keepdims=True).reshape(ow_ref.shape)

        # TODO(synk): on v7x, if the VALU slot saturates, offload the
        # plane+row reduction to the idle MXU via a ones-vector contraction.
        # TODO(synk): merging the two outputs into one lane-dense (g, 2, W)
        # slab would halve the (tiny) per-step output DMAs.

    return kernel


def _pick_planes_per_step(num_planes, plane_f32_bytes):
    """Largest plane count whose f32 chunk fits the per-step tile budget.

    No divisibility requirement on `num_planes`: the wrapper uses a cdiv grid
    and masks the partial last block inside the kernel.
    """
    budget_planes = max(1, _TARGET_TILE_BYTES // max(plane_f32_bytes, 1))
    return int(min(num_planes, budget_planes))


def tv_loss(x, tv_loss_weight=1.0, *, planes_per_step=None):
    """Pallas TPU implementation of TVLoss.forward for NCHW input `x`.

    `planes_per_step` is a test/tuning override for the per-grid-step chunk.
    """
    n, c, h, w = x.shape
    if h < 2 or w < 2:
        # The PyTorch module divides by count_h/count_w == 0 here (inf/nan);
        # we reject the degenerate case instead of reproducing the div-by-zero.
        raise ValueError("TVLoss requires H >= 2 and W >= 2.")

    count_h = c * (h - 1) * w     # tensor_size(x[:, :, 1:, :])
    count_w = c * h * (w - 1)     # tensor_size(x[:, :, :, 1:])

    num_planes = n * c
    x_flat = x.reshape(num_planes, h, w)          # free reshape, no copy

    p = planes_per_step or _pick_planes_per_step(num_planes, h * w * 4)
    p = int(min(p, num_planes))
    g = pl.cdiv(num_planes, p)                    # number of grid steps / chunks
    mask_last_block = (num_planes % p) != 0       # static decision, no runtime cost if False
    # TODO(synk): planes larger than the per-step VMEM budget (e.g. >~1k x 1k
    # f32) would additionally need H-tiling with a 1-row halo; not needed here.

    kernel = _make_tv_kernel(num_planes, p, mask_last_block)

    out_h, out_w = pl.pallas_call(
        kernel,
        out_shape=(
            jax.ShapeDtypeStruct((g, 1, w), jnp.float32),
            jax.ShapeDtypeStruct((g, 1, w - 1), jnp.float32),
        ),
        grid_spec=pltpu.PrefetchScalarGridSpec(
            num_scalar_prefetch=0,
            grid=(g,),
            in_specs=[pl.BlockSpec((p, h, w), lambda i: (i, 0, 0))],
            out_specs=(
                pl.BlockSpec((1, 1, w), lambda i: (i, 0, 0)),
                pl.BlockSpec((1, 1, w - 1), lambda i: (i, 0, 0)),
            ),
        ),
        compiler_params=pltpu.CompilerParams(
            # Chunks are fully independent; on v7x the two TensorCores can
            # split them with no shared scratch.
            # TODO(synk): confirm via xprof that both v7x TCs are active; if
            # not, switch this axis to pltpu.CORE_PARALLEL.
            dimension_semantics=("parallel",),
            vmem_limit_bytes=_VMEM_LIMIT_BYTES,
        ),
    )(x_flat)

    # Tiny final combine: one cross-lane reduce + scalar normalization in XLA.
    h_tv = jnp.sum(out_h)
    w_tv = jnp.sum(out_w)
    return (tv_loss_weight * 2.0
            * (h_tv / count_h + w_tv / count_w) / n).astype(jnp.float32)


def tv_loss_ref(x, tv_loss_weight=1.0):
    """Plain-JAX reference mirroring the PyTorch forward (f32 math)."""
    x = x.astype(jnp.float32)
    n, c, h, w = x.shape
    count_h = c * (h - 1) * w
    count_w = c * h * (w - 1)
    h_tv = jnp.sum((x[:, :, 1:, :] - x[:, :, : h - 1, :]) ** 2)
    w_tv = jnp.sum((x[:, :, :, 1:] - x[:, :, :, : w - 1]) ** 2)
    return tv_loss_weight * 2.0 * (h_tv / count_h + w_tv / count_w) / n


if __name__ == "__main__":
    key = jax.random.PRNGKey(0)
    x = jax.random.normal(key, (2, 4, 16, 16), dtype=jnp.float32)
    ref = tv_loss_ref(x, tv_loss_weight=1.0)

    # 1) Default chunking (all 8 planes in one grid step).
    out = jax.block_until_ready(tv_loss(x, tv_loss_weight=1.0))
    assert jnp.allclose(out, ref, rtol=1e-5, atol=1e-5), (out, ref)

    # 2) Non-dividing chunk size (8 planes in steps of 3) exercises the
    #    cdiv grid + masked partial last block.
    out_pad = jax.block_until_ready(tv_loss(x, tv_loss_weight=1.0, planes_per_step=3))
    assert jnp.allclose(out_pad, ref, rtol=1e-5, atol=1e-5), (out_pad, ref)

    # 3) bf16 input: diffs taken in bf16 then accumulated in f32 (slightly
    #    different rounding than cast-then-subtract; loose tolerance).
    x_bf16 = x.astype(jnp.bfloat16)
    ref_bf16 = tv_loss_ref(x_bf16, tv_loss_weight=1.0)
    out_bf16 = jax.block_until_ready(tv_loss(x_bf16, tv_loss_weight=1.0))
    assert jnp.allclose(out_bf16, ref_bf16, rtol=2e-2, atol=2e-2), (out_bf16, ref_bf16)

    print("KERNEL_OK")
</pallas_src>

<mosaic_0001>
module attributes {stable_mosaic.version = 11 : i64} {
  func.func @kernel(%arg0: i32, %arg1: memref<8x16x16xf32, #tpu.memory_space<vmem>>, %arg2: memref<1x1x16xf32, #tpu.memory_space<vmem>>, %arg3: memref<1x1x15xf32, #tpu.memory_space<vmem>>) attributes {dimension_semantics = [#tpu.dimension_semantics<parallel>], iteration_bounds = array<i64: 1>, scalar_prefetch = 0 : i64, scratch_operands = 0 : i64, tpu.core_type = #tpu.core_type<tc>, window_params = [{transform_indices = @transform_0, window_bounds = array<i64: 8, 16, 16>}, {transform_indices = @transform_1, window_bounds = array<i64: 1, 1, 16>}, {transform_indices = @transform_2, window_bounds = array<i64: 1, 1, 15>}]} {
    %c0 = arith.constant 0 : index
    %c0_0 = arith.constant 0 : index
    %c0_1 = arith.constant 0 : index
    %0 = vector.load %arg1[%c0, %c0_0, %c0_1] : memref<8x16x16xf32, #tpu.memory_space<vmem>>, vector<8x16x16xf32>
    %1 = vector.extract_strided_slice %0 {offsets = [0, 1, 0], sizes = [8, 15, 16], strides = [1, 1, 1]} : vector<8x16x16xf32> to vector<8x15x16xf32>
    %2 = vector.extract_strided_slice %0 {offsets = [0, 0, 0], sizes = [8, 15, 16], strides = [1, 1, 1]} : vector<8x16x16xf32> to vector<8x15x16xf32>
    %3 = arith.subf %1, %2 : vector<8x15x16xf32>
    %4 = arith.mulf %3, %3 : vector<8x15x16xf32>
    %cst = arith.constant dense<0.000000e+00> : vector<15x16xf32>
    %5 = vector.multi_reduction <add>, %4, %cst [0] : vector<8x15x16xf32> to vector<15x16xf32>
    %cst_2 = arith.constant dense<0.000000e+00> : vector<16xf32>
    %6 = vector.multi_reduction <add>, %5, %cst_2 [0] : vector<15x16xf32> to vector<16xf32>
    %7 = vector.shape_cast %6 : vector<16xf32> to vector<1x16xf32>
    %8 = vector.shape_cast %7 : vector<1x16xf32> to vector<1x1x16xf32>
    %c0_3 = arith.constant 0 : index
    %c0_4 = arith.constant 0 : index
    %c0_5 = arith.constant 0 : index
    %9 = vector.load %arg2[%c0_3, %c0_4, %c0_5] : memref<1x1x16xf32, #tpu.memory_space<vmem>>, vector<1x1x16xf32>
    tpu.vector_store %arg2[%c0_3, %c0_4, %c0_5], %8 {strides = array<i32>} : memref<1x1x16xf32, #tpu.memory_space<vmem>>, vector<1x1x16xf32>,
    %10 = vector.extract_strided_slice %0 {offsets = [0, 0, 1], sizes = [8, 16, 15], strides = [1, 1, 1]} : vector<8x16x16xf32> to vector<8x16x15xf32>
    %11 = vector.extract_strided_slice %0 {offsets = [0, 0, 0], sizes = [8, 16, 15], strides = [1, 1, 1]} : vector<8x16x16xf32> to vector<8x16x15xf32>
    %12 = arith.subf %10, %11 : vector<8x16x15xf32>
    %13 = arith.mulf %12, %12 : vector<8x16x15xf32>
    %cst_6 = arith.constant dense<0.000000e+00> : vector<16x15xf32>
    %14 = vector.multi_reduction <add>, %13, %cst_6 [0] : vector<8x16x15xf32> to vector<16x15xf32>
    %cst_7 = arith.constant dense<0.000000e+00> : vector<15xf32>
    %15 = vector.multi_reduction <add>, %14, %cst_7 [0] : vector<16x15xf32> to vector<15xf32>
    %16 = vector.shape_cast %15 : vector<15xf32> to vector<1x15xf32>
    %17 = vector.shape_cast %16 : vector<1x15xf32> to vector<1x1x15xf32>
    %c0_8 = arith.constant 0 : index
    %c0_9 = arith.constant 0 : index
    %c0_10 = arith.constant 0 : index
    %18 = vector.load %arg3[%c0_8, %c0_9, %c0_10] : memref<1x1x15xf32, #tpu.memory_space<vmem>>, vector<1x1x15xf32>
    tpu.vector_store %arg3[%c0_8, %c0_9, %c0_10], %17 {strides = array<i32>} : memref<1x1x15xf32, #tpu.memory_space<vmem>>, vector<1x1x15xf32>,
    return
  }
  func.func @transform_0(%arg0: i32) -> (i32, i32, i32) {
    %c0_i32 = arith.constant 0 : i32
    %c0_i32_0 = arith.constant 0 : i32
    %c0_i32_1 = arith.constant 0 : i32
    return %arg0, %c0_i32, %c0_i32_0 : i32, i32, i32
  }
  func.func @transform_1(%arg0: i32) -> (i32, i32, i32) {
    %c0_i32 = arith.constant 0 : i32
    %c0_i32_0 = arith.constant 0 : i32
    %c0_i32_1 = arith.constant 0 : i32
    return %arg0, %c0_i32, %c0_i32_0 : i32, i32, i32
  }
  func.func @transform_2(%arg0: i32) -> (i32, i32, i32) {
    %c0_i32 = arith.constant 0 : i32
    %c0_i32_0 = arith.constant 0 : i32
    %c0_i32_1 = arith.constant 0 : i32
    return %arg0, %c0_i32, %c0_i32_0 : i32, i32, i32
  }
}

</mosaic_0001>

<bundles_post_ra>
// kernel: tpu_custom_call.1
= control target key start
LH: loop header
LB: loop body
LE: loop exit
PB: predicated region body
PF: predicated region fallthrough
CT: control target
= control target key end

     0   :  { %8 = vsyncpa [#allocation3], 0  ;;  %s614_s0 = inlined_call_operand.hbm [shape: f32[8,16,16], index: 0, kind: input, shape index: {}]   ;;  %s615_s1 = inlined_call_operand.hbm [shape: f32[1,1,16], index: 1, kind: output, shape index: {0}]   ;;  %s616_s2 = inlined_call_operand.hbm [shape: f32[1,1,15], index: 2, kind: output, shape index: {1}]  }
   0x1   :  { %9 = vsyncpa [#allocation4], 0 }
   0x2   :  { %10 = vsyncpa [#allocation7], 0  ;;  %s417_s9 = smov [#allocation2]   ;;  %s345_s13 = scalar_lea.hbm %s614_s0, 2048 }
   0x3   :  { %s16_s10 = sshll.u32 %s417_s9, 4  ;;  %p346_p0 = scmp.ne.s32.totalorder %s614_s0, %s345_s13  ;;  %s17_s10 = int_to_ptr.vmem [resolvable:$true] %s16_s10 }
   0x4   :  { %p349_p1 = scmp.lt.u32.totalorder %s345_s13, %s614_s0 }
   0x6   :  { %p351_p2 = pnand %p349_p1, %p346_p0 }
   0x8   :  { %354 = shalt.err (!%p351_p2)
}
   0x9   :  { %s355_s18 = scalar_lea.vmem %s17_s10, 2048  ;;  %p360_p4 = scmp.lt.s32.totalorder %s17_s10, %s17_s10 }
   0xa   :  { %p356_p3 = scmp.ne.s32.totalorder %s17_s10, %s355_s18  ;;  %p361_p5 = scmp.lt.s32.totalorder %s355_s18, %s355_s18 }
   0xc   :  { %p362_p6 = por %p361_p5, %p360_p4 }
   0xe   :  { %p363_p7 = pnand %p362_p6, %p356_p3 }
  0x10   :  { %366 = shalt.err (!%p363_p7)
}
  0x11   :  { %s418_s19 = smov 128   ;;  %s419_s20 = smov 8  }
  0x12   :  { %22 = dma.hbm_to_vmem [thread:$0]  %s614_s0, 2048, %s17_s10, [#allocation3], %s418_s19, %s418_s19, %s419_s20  }
  0x13   :  { %411 = dma.done.wait [#allocation3], 2048  }
  0x14   :  { %412 = vsyncadd [#allocation3], 4294965248  ;;  %v451_v0 = vld [vmem:[#allocation2 + $0x10] sm:$0xff]  ;;  %v453_v1 = vld [vmem:[#allocation2] sm:$0xff]  ;;  %s420_s23 = smov 1   ;;  %vm58_vm0 = vcmask 1040384  }
  0x15   :  { %187 = vrot.lane.b32.xlu1 %v451_v0, %s420_s23  ;;  %183 = vrot.lane.b32.xlu0 %v453_v1, %s420_s23  ;;  %v457_v2 = vld [vmem:[#allocation2 + $0x18] sm:$0xff]  ;;  %v459_v3 = vld [vmem:[#allocation2 + $0x8] sm:$0xff]  ;;  %v465_v5 = vld [vmem:[#allocation2 + $0x20] sm:$0xff]  ;;  %v62_v16 = vrot.slane %v451_v0, 7  ;;  %v59_v17 = vrot.slane %v453_v1, 7  ;;  %vm131_vm1 = vcmask 130049  }
  0x16   :  { %v463_v4 = vld [vmem:[#allocation2 + $0x28] sm:$0xff]  ;;  %v469_v6 = vld [vmem:[#allocation2 + $0x38] sm:$0xff]  ;;  %v471_v7 = vld [vmem:[#allocation2 + $0x30] sm:$0xff]  ;;  %v63_v18 = vrot.slane %v457_v2, 7  ;;  %v60_v19 = vrot.slane %v459_v3, 7  ;;  %v65_v21 = vrot.slane %v465_v5, 7 }
  0x17   :  { %v475_v8 = vld [vmem:[#allocation2 + $0x48] sm:$0xff]  ;;  %v477_v9 = vld [vmem:[#allocation2 + $0x40] sm:$0xff]  ;;  %v481_v10 = vld [vmem:[#allocation2 + $0x58] sm:$0xff]  ;;  %v101_v20 = vsub.f32 %v451_v0, %v62_v16  ;;  %v99_v22 = vsub.f32 %v453_v1, %v59_v17  ;;  %v66_v24 = vrot.slane %v463_v4, 7  ;;  %v69_v29 = vrot.slane %v469_v6, 7  ;;  %s421_s0 = smov [#allocation5]  }
  0x18   :  { %v483_v11 = vld [vmem:[#allocation2 + $0x50] sm:$0xff]  ;;  %v487_v12 = vld [vmem:[#allocation2 + $0x68] sm:$0xff]  ;;  %v489_v13 = vld [vmem:[#allocation2 + $0x60] sm:$0xff]  ;;  %v64_v23 = vsel %vm58_vm0, %v62_v16, %v63_v18  ;;  %v61_v25 = vsel %vm58_vm0, %v59_v17, %v60_v19  ;;  %v103_v28 = vsub.f32 %v465_v5, %v65_v21  ;;  %v68_v33 = vrot.slane %v471_v7, 7  ;;  %s315_s24 = sshll.u32 %s421_s0, 4  ;;  %s316_s24 = int_to_ptr.vmem [resolvable:$true] %s315_s24 }
  0x19   :  { %189 = vrot.lane.b32.xlu1 %v457_v2, %s420_s23  ;;  %185 = vrot.lane.b32.xlu0 %v459_v3, %s420_s23  ;;  %v493_v14 = vld [vmem:[#allocation2 + $0x78] sm:$0xff]  ;;  %v495_v15 = vld [vmem:[#allocation2 + $0x70] sm:$0xff]  ;;  %v117_v26 = vmul.f32 %v101_v20, %v101_v20  ;;  %v102_v27 = vsub.f32 %v457_v2, %v64_v23  ;;  %v115_v30 = vmul.f32 %v99_v22, %v99_v22  ;;  %vm147_vm2 = vcmask 130048   ;;  %s367_s25 = scalar_lea.vmem %s316_s24, 16  ;;  %s371_s26 = scalar_lea.vmem %s316_s24, 32 }
  0x1a   :  { %v100_v31 = vsub.f32 %v459_v3, %v61_v25  ;;  %v67_v32 = vsel %vm58_vm0, %v65_v21, %v66_v24  ;;  %v119_v37 = vmul.f32 %v103_v28, %v103_v28  ;;  %v70_v40 = vsel %vm58_vm0, %v68_v33, %v69_v29  ;;  %p368_p8 = scmp.ne.s32.totalorder %s316_s24, %s367_s25  ;;  %p372_p9 = scmp.lt.s32.totalorder %s316_s24, %s316_s24 }
  0x1b   :  { %v133_v34 = vsel %vm131_vm1, %v117_v26, 0.0  ;;  %v118_v35 = vmul.f32 %v102_v27, %v102_v27  ;;  %v104_v36 = vsub.f32 %v463_v4, %v67_v32  ;;  %v132_v38 = vsel %vm131_vm1, %v115_v30, 0.0  ;;  %p373_p10 = scmp.lt.s32.totalorder %s371_s26, %s367_s25 }
  0x1c   :  { %v116_v39 = vmul.f32 %v100_v31, %v100_v31  ;;  %v105_v41 = vsub.f32 %v471_v7, %v68_v33  ;;  %v72_v42 = vrot.slane %v475_v8, 7  ;;  %v71_v43 = vrot.slane %v477_v9, 7 }
  0x1d   :  { %193 = vrot.lane.b32.xlu1 %v463_v4, %s420_s23  ;;  %191 = vrot.lane.b32.xlu0 %v465_v5, %s420_s23  ;;  %v134_v44 = vadd.f32 %v133_v34, %v132_v38  ;;  %v120_v45 = vmul.f32 %v104_v36, %v104_v36  ;;  %v106_v46 = vsub.f32 %v469_v6, %v70_v40  ;;  %v149_v47 = vsel %vm147_vm2, %v118_v35, 0.0  ;;  %p374_p11 = por %p373_p10, %p372_p9 }
  0x1e   :  { %v148_v48 = vsel %vm147_vm2, %v116_v39, 0.0  ;;  %v135_v49 = vsel %vm131_vm1, %v119_v37, 0.0  ;;  %v121_v50 = vmul.f32 %v105_v41, %v105_v41  ;;  %v73_v51 = vsel %vm58_vm0, %v71_v43, %v72_v42 }
  0x1f   :  { %v107_v52 = vsub.f32 %v477_v9, %v71_v43  ;;  %v75_v53 = vrot.slane %v481_v10, 7  ;;  %v74_v54 = vrot.slane %v483_v11, 7  ;;  %v150_v55 = vadd.f32 %v149_v47, %v148_v48  ;;  %p375_p12 = pnand %p374_p11, %p368_p8 }
  0x20   :  { %v151_v56 = vsel %vm147_vm2, %v120_v45, 0.0  ;;  %v136_v57 = vadd.f32 %v135_v49, %v134_v44  ;;  %v122_v58 = vmul.f32 %v106_v46, %v106_v46  ;;  %v137_v59 = vsel %vm131_vm1, %v121_v50, 0.0 }
  0x21   :  { %197 = vrot.lane.b32.xlu1 %v469_v6, %s420_s23  ;;  %195 = vrot.lane.b32.xlu0 %v471_v7, %s420_s23  ;;  %v108_v60 = vsub.f32 %v475_v8, %v73_v51  ;;  %v78_v61 = vrot.slane %v487_v12, 7  ;;  %v77_v62 = vrot.slane %v489_v13, 7  ;;  %v123_v63 = vmul.f32 %v107_v52, %v107_v52 }
  0x22   :  { %v76_v16 = vsel %vm58_vm0, %v74_v54, %v75_v53  ;;  %v109_v17 = vsub.f32 %v483_v11, %v74_v54  ;;  %v152_v18 = vadd.f32 %v151_v56, %v150_v55  ;;  %v153_v19 = vsel %vm147_vm2, %v122_v58, 0.0 }
  0x23   :  { %v138_v20 = vadd.f32 %v137_v59, %v136_v57  ;;  %v124_v21 = vmul.f32 %v108_v60, %v108_v60  ;;  %v110_v22 = vsub.f32 %v481_v10, %v76_v16  ;;  %v79_v23 = vsel %vm58_vm0, %v77_v62, %v78_v61 }
  0x24   :  { %v80_v24 = vrot.slane %v495_v15, 7  ;;  %v139_v25 = vsel %vm131_vm1, %v123_v63, 0.0  ;;  %v125_v26 = vmul.f32 %v109_v17, %v109_v17  ;;  %v111_v27 = vsub.f32 %v489_v13, %v77_v62 }
  0x25   :  { %201 = vrot.lane.b32.xlu1 %v475_v8, %s420_s23  ;;  %199 = vrot.lane.b32.xlu0 %v477_v9, %s420_s23  ;;  %v81_v28 = vrot.slane %v493_v14, 7  ;;  %v154_v31 = vadd.f32 %v153_v19, %v152_v18  ;;  %v112_v32 = vsub.f32 %v487_v12, %v79_v23  ;;  %v155_v33 = vsel %vm147_vm2, %v124_v21, 0.0 }
  0x26   :  { %v140_v34 = vadd.f32 %v139_v25, %v138_v20  ;;  %v126_v35 = vmul.f32 %v110_v22, %v110_v22  ;;  %v113_v36 = vsub.f32 %v495_v15, %v80_v24  ;;  %v141_v37 = vsel %vm131_vm1, %v125_v26, 0.0 }
  0x27   :  { %v127_v38 = vmul.f32 %v111_v27, %v111_v27  ;;  %v82_v39 = vsel %vm58_vm0, %v80_v24, %v81_v28  ;;  %v156_v42 = vadd.f32 %v155_v33, %v154_v31  ;;  %v128_v43 = vmul.f32 %v112_v32, %v112_v32 }
  0x28   :  { %v157_v44 = vsel %vm147_vm2, %v126_v35, 0.0  ;;  %v142_v45 = vadd.f32 %v141_v37, %v140_v34  ;;  %v114_v46 = vsub.f32 %v493_v14, %v82_v39  ;;  %v129_v47 = vmul.f32 %v113_v36, %v113_v36 }
  0x29   :  { %205 = vrot.lane.b32.xlu1 %v481_v10, %s420_s23  ;;  %203 = vrot.lane.b32.xlu0 %v483_v11, %s420_s23  ;;  %v143_v48 = vsel %vm131_vm1, %v127_v38, 0.0  ;;  %v158_v55 = vadd.f32 %v157_v44, %v156_v42  ;;  %v159_v56 = vsel %vm147_vm2, %v128_v43, 0.0  ;;  %vm263_vm3 = vcmask 130056  }
  0x2a   :  { %v144_v57 = vadd.f32 %v143_v48, %v142_v45  ;;  %v130_v58 = vmul.f32 %v114_v46, %v114_v46  ;;  %v145_v59 = vsel %vm131_vm1, %v129_v47, 0.0  ;;  %vm165_vm4 = vcmask 1046528  }
  0x2b   :  { %v160_v17 = vadd.f32 %v159_v56, %v158_v55  ;;  %vm172_vm5 = vcmask 129024   ;;  %vm181_vm6 = vcmask 122880  }
  0x2c   :  { %v161_v19 = vsel %vm147_vm2, %v130_v58, 0.0  ;;  %v146_v20 = vadd.f32 %v145_v59, %v144_v57 }
  0x2d   :  { %209 = vrot.lane.b32.xlu1 %v487_v12, %s420_s23  ;;  %207 = vrot.lane.b32.xlu0 %v489_v13, %s420_s23 }
  0x31   :  { %213 = vrot.lane.b32.xlu1 %v493_v14, %s420_s23  ;;  %211 = vrot.lane.b32.xlu0 %v495_v15, %s420_s23 }
  0x87   :  { %v188_v29 = vpop.permute.xlu1 %187  ;;  %v184_v30 = vpop.permute.xlu0 %183 }
  0x88   :  { %v233_v49 = vsub.f32 %v451_v0, %v188_v29  ;;  %v231_v50 = vsub.f32 %v453_v1, %v184_v30  ;;  %v162_v29 = vadd.f32 %v161_v19, %v160_v17  ;;  %v166_v30 = vrot.slane %v146_v20, 1 }
  0x8a   :  { %v249_v60 = vmul.f32 %v233_v49, %v233_v49  ;;  %v247_v61 = vmul.f32 %v231_v50, %v231_v50  ;;  %v167_v37 = vrot.slane %v162_v29, 1 }
  0x8b   :  { %v190_v40 = vpop.permute.xlu1 %189  ;;  %v186_v41 = vpop.permute.xlu0 %185 }
  0x8c   :  { %v234_v53 = vsub.f32 %v457_v2, %v190_v40  ;;  %v232_v54 = vsub.f32 %v459_v3, %v186_v41  ;;  %v265_v21 = vsel %vm263_vm3, %v249_v60, 0.0  ;;  %v264_v22 = vsel %vm263_vm3, %v247_v61, 0.0 }
  0x8d   :  { %v266_v31 = vadd.f32 %v265_v21, %v264_v22  ;;  %v168_v44 = vsel %vm165_vm4, %v166_v30, %v167_v37  ;;  %v173_v45 = vsel %vm172_vm5, %v167_v37, 0.0 }
  0x8e   :  { %v250_v16 = vmul.f32 %v234_v53, %v234_v53  ;;  %v248_v2 = vmul.f32 %v232_v54, %v232_v54  ;;  %v171_v50 = vsel %vm147_vm2, %v168_v44, 0.0 }
  0x8f   :  { %v194_v51 = vpop.permute.xlu1 %193  ;;  %v192_v52 = vpop.permute.xlu0 %191  ;;  %v174_v55 = vadd.f32 %v173_v45, %v171_v50 }
  0x90   :  { %v236_v62 = vsub.f32 %v463_v4, %v194_v51  ;;  %v235_v0 = vsub.f32 %v465_v5, %v192_v52  ;;  %v280_v25 = vsel %vm263_vm3, %v250_v16, 0.0  ;;  %v279_v26 = vsel %vm263_vm3, %v248_v2, 0.0 }
  0x91   :  { %v281_v32 = vadd.f32 %v280_v25, %v279_v26 }
  0x92   :  { %v252_v4 = vmul.f32 %v236_v62, %v236_v62  ;;  %v251_v23 = vmul.f32 %v235_v0, %v235_v0 }
  0x93   :  { %v198_v1 = vpop.permute.xlu1 %197  ;;  %v196_v63 = vpop.permute.xlu0 %195 }
  0x94   :  { %v238_v3 = vsub.f32 %v469_v6, %v198_v1  ;;  %v237_v18 = vsub.f32 %v471_v7, %v196_v63  ;;  %v282_v33 = vsel %vm263_vm3, %v252_v4, 0.0  ;;  %v267_v34 = vsel %vm263_vm3, %v251_v23, 0.0 }
  0x95   :  { %v283_v46 = vadd.f32 %v282_v33, %v281_v32  ;;  %v268_v47 = vadd.f32 %v267_v34, %v266_v31  ;;  %v175_v1 = vrot.slane %v174_v55, 4 }
  0x96   :  { %v254_v7 = vmul.f32 %v238_v3, %v238_v3  ;;  %v253_v28 = vmul.f32 %v237_v18, %v237_v18 }
  0x97   :  { %v202_v5 = vpop.permute.xlu1 %201  ;;  %v200_v24 = vpop.permute.xlu0 %199  ;;  %v176_v3 = vadd.f32 %v175_v1, %v174_v55 }
  0x98   :  { %v240_v27 = vsub.f32 %v475_v8, %v202_v5  ;;  %v239_v6 = vsub.f32 %v477_v9, %v200_v24  ;;  %v284_v9 = vsel %vm263_vm3, %v254_v7, 0.0  ;;  %v269_v41 = vsel %vm263_vm3, %v253_v28, 0.0 }
  0x99   :  { %v285_v53 = vadd.f32 %v284_v9, %v283_v46  ;;  %v270_v54 = vadd.f32 %v269_v41, %v268_v47  ;;  %v177_v22 = vrot.slane %v176_v3, 2 }
  0x9a   :  { %v256_v38 = vmul.f32 %v240_v27, %v240_v27  ;;  %v255_v39 = vmul.f32 %v239_v6, %v239_v6 }
  0x9b   :  { %v206_v35 = vpop.permute.xlu1 %205  ;;  %v204_v36 = vpop.permute.xlu0 %203  ;;  %v178_v25 = vadd.f32 %v177_v22, %v176_v3 }
  0x9c   :  { %v242_v40 = vsub.f32 %v481_v10, %v206_v35  ;;  %v241_v8 = vsub.f32 %v483_v11, %v204_v36  ;;  %v286_v10 = vsel %vm263_vm3, %v256_v38, 0.0  ;;  %v271_v11 = vsel %vm263_vm3, %v255_v39, 0.0 }
  0x9d   :  { %v287_v60 = vadd.f32 %v286_v10, %v285_v53  ;;  %v272_v61 = vadd.f32 %v271_v11, %v270_v54 }
  0x9e   :  { %v258_v42 = vmul.f32 %v242_v40, %v242_v40  ;;  %v257_v43 = vmul.f32 %v241_v8, %v241_v8 }
  0x9f   :  { %v210_v48 = vpop.permute.xlu1 %209  ;;  %v208_v49 = vpop.permute.xlu0 %207 }
  0xa0   :  { %v244_v51 = vsub.f32 %v487_v12, %v210_v48  ;;  %v243_v52 = vsub.f32 %v489_v13, %v208_v49  ;;  %v288_v56 = vsel %vm263_vm3, %v258_v42, 0.0  ;;  %v273_v57 = vsel %vm263_vm3, %v257_v43, 0.0 }
  0xa1   :  { %v289_v2 = vadd.f32 %v288_v56, %v287_v60  ;;  %v274_v17 = vadd.f32 %v273_v57, %v272_v61 }
  0xa2   :  { %v260_v58 = vmul.f32 %v244_v51, %v244_v51  ;;  %v259_v59 = vmul.f32 %v243_v52, %v243_v52 }
  0xa3   :  { %v214_v62 = vpop.permute.xlu1 %213  ;;  %v212_v0 = vpop.permute.xlu0 %211 }
  0xa4   :  { %v290_v63 = vsel %vm263_vm3, %v260_v58, 0.0  ;;  %v275_v12 = vsel %vm263_vm3, %v259_v59, 0.0  ;;  %v246_v13 = vsub.f32 %v493_v14, %v214_v62  ;;  %v245_v16 = vsub.f32 %v495_v15, %v212_v0 }
  0xa5   :  { %v291_v20 = vadd.f32 %v290_v63, %v289_v2  ;;  %v276_v21 = vadd.f32 %v275_v12, %v274_v17  ;;  %v179_v15 = vrot.slane %v178_v25, 1 }
  0xa6   :  { %v262_v18 = vmul.f32 %v246_v13, %v246_v13  ;;  %v261_v19 = vmul.f32 %v245_v16, %v245_v16 }
  0xa7   :  { %v180_v6 = vadd.f32 %v179_v15, %v178_v25 }
  0xa8   :  { %v292_v4 = vsel %vm263_vm3, %v262_v18, 0.0  ;;  %v277_v23 = vsel %vm263_vm3, %v261_v19, 0.0 }
  0xa9   :  { %v293_v5 = vadd.f32 %v292_v4, %v291_v20  ;;  %v278_v24 = vadd.f32 %v277_v23, %v276_v21  ;;  %182 = vst.msk [vmem:[#allocation5] sm:$0x1] %vm181_vm6, %v180_v6 }
  0xab   :  { %v295_v26 = vsel %vm263_vm3, %v293_v5, 0.0  ;;  %v294_v14 = vsel %vm263_vm3, %v278_v24, 0.0 }
  0xac   :  { %v296_v27 = vadd.f32 %v295_v26, %v294_v14 }
  0xae   :  { %v297_v7 = vrot.slane %v296_v27, 4 }
  0xb0   :  { %v298_v28 = vadd.f32 %v297_v7, %v296_v27 }
  0xb1   :  { %378 = shalt.err (!%p375_p12)
}
  0xb2   :  { %s379_s29 = scalar_lea.hbm %s615_s1, 16 }
  0xb3   :  { %p380_p13 = scmp.ne.s32.totalorder %s615_s1, %s379_s29  ;;  %p383_p0 = scmp.lt.u32.totalorder %s379_s29, %s615_s1 }
  0xb5   :  { %p385_p1 = pnand %p383_p0, %p380_p13 }
  0xb7   :  { %388 = shalt.err (!%p385_p1)
}
  0xb8   :  { %318 = dma.vmem_to_hbm [thread:$0]  %s316_s24, 16, %s615_s1, [#allocation4]   ;;  %v299_v29 = vrot.slane %v298_v28, 2  ;;  %vm307_vm7 = vcmask 114688  }
  0xb9   :  { %s422_s8 = smov 127   ;;  %s423_s9 = smov [#allocation6]  }
  0xba   :  { %v300_v30 = vadd.f32 %v299_v29, %v298_v28  ;;  %s325_s10 = sshll.u32 %s423_s9, 4  ;;  %s326_s10 = int_to_ptr.vmem [resolvable:$true] %s325_s10 }
  0xbb   :  { %s389_s11 = scalar_lea.vmem %s326_s10, 16  ;;  %s393_s12 = scalar_lea.vmem %s326_s10, 32 }
  0xbc   :  { %v301_v31 = vrot.slane %v300_v30, 1  ;;  %p390_p2 = scmp.ne.s32.totalorder %s326_s10, %s389_s11  ;;  %p394_p3 = scmp.lt.s32.totalorder %s326_s10, %s326_s10 }
  0xbd   :  { %p395_p4 = scmp.lt.s32.totalorder %s393_s12, %s389_s11 }
  0xbe   :  { %v302_v32 = vadd.f32 %v301_v31, %v300_v30 }
  0xbf   :  { %p396_p5 = por %p395_p4, %p394_p3 }
  0xc0   :  { %304 = vrot.lane.b32.xlu0 %v302_v32, %s422_s8 }
  0xc1   :  { %p397_p6 = pnand %p396_p5, %p390_p2 }
 0x132   :  { %v305_v33 = vpop.permute.xlu0 %304 }
 0x133   :  { %308 = vst.msk [vmem:[#allocation6] sm:$0x1] %vm307_vm7, %v305_v33 }
 0x134   :  { %400 = shalt.err (!%p397_p6)
}
 0x135   :  { %s401_s14 = scalar_lea.hbm %s616_s2, 16 }
 0x136   :  { %p402_p7 = scmp.ne.s32.totalorder %s616_s2, %s401_s14  ;;  %p405_p8 = scmp.lt.u32.totalorder %s401_s14, %s616_s2 }
 0x138   :  { %p407_p9 = pnand %p405_p8, %p402_p7 }
 0x13a   :  { %410 = shalt.err (!%p407_p9)
}
 0x13b   :  { %328 = dma.vmem_to_hbm [thread:$0]  %s326_s10, 16, %s616_s2, [#allocation7]  }
 0x13c   :  { %413 = dma.done.wait [#allocation4], 16  }
 0x13d   :  { %414 = vsyncadd [#allocation4], 4294967280 }
 0x13e   :  { %415 = dma.done.wait [#allocation7], 16  }
 0x13f   :  { %416 = vsyncadd [#allocation7], 4294967280 }
 0x140   :  { %335 = vsyncpa [#allocation3], 1 }
 0x141   :  { %336 = vsyncpa [#allocation4], 1 }
 0x142   :  { %337 = vsyncpa [#allocation7], 1 }

</bundles_post_ra>
